<compile_context>
chip_gen: v7x
topology: tpu7x:2x2x1
jax: 0.10.0
libtpu: 0.0.40
codegen_flags: <defaults>
</compile_context>

<pallas_src>
import numpy as np
import jax
import jax.numpy as jnp
from jax.experimental import pallas as pl
from jax.experimental.pallas import tpu as pltpu


def glow_revnet1d_kernel(
    x_ref,
    pw1_ref, pb1_ref, pw2_ref, pb2_ref,
    w1_ref, b1_ref, w2_ref, b2_ref, w3_ref, b3_ref,
    w4m_ref, b4m_ref, w4s_ref, b4s_ref,
    y1_ref, y2_ref, logdet_ref,
):
    x = x_ref[...]  # (TILE_B, C) f32; ActNorm already folded into pw1/pw2

    # Permutation (InvertibleLinear, bias=False) with ActNorm folded in.
    # pw is pre-split column-wise so z1/z2 come out lane-dense (no slicing).
    z1 = jnp.dot(x, pw1_ref[...], preferred_element_type=jnp.float32) + pb1_ref[...]
    z2 = jnp.dot(x, pw2_ref[...], preferred_element_type=jnp.float32) + pb2_ref[...]

    # Coupling MLP f(z1): (Linear -> ReLU) x3 -> Linear, last layer pre-split
    # into mean / scale heads.  Operands may be bf16; accumulation is f32.
    mlp_dtype = w1_ref.dtype
    h = jnp.dot(z1.astype(mlp_dtype), w1_ref[...],
                preferred_element_type=jnp.float32) + b1_ref[...]
    h = jnp.maximum(h, 0.0).astype(mlp_dtype)
    h = jnp.dot(h, w2_ref[...], preferred_element_type=jnp.float32) + b2_ref[...]
    h = jnp.maximum(h, 0.0).astype(mlp_dtype)
    h = jnp.dot(h, w3_ref[...], preferred_element_type=jnp.float32) + b3_ref[...]
    h = jnp.maximum(h, 0.0).astype(mlp_dtype)
    mean_c = jnp.dot(h, w4m_ref[...], preferred_element_type=jnp.float32) + b4m_ref[...]
    pre = jnp.dot(h, w4s_ref[...], preferred_element_type=jnp.float32) + b4s_ref[...]
    scale = jax.nn.sigmoid(pre + 4.0) + 1e-10

    # Lane-dense stores of the two output halves; no concatenate in-kernel.
    y1_ref[...] = z1.astype(y1_ref.dtype)
    y2_ref[...] = ((z2 + mean_c) * scale).astype(y2_ref.dtype)
    # Per-sample coupling log-det (reduced over exactly `half` real lanes).
    logdet_ref[...] = jnp.sum(jnp.log(scale), axis=-1, keepdims=True)


def make_params(key, in_channels, interm_channels):
    """Raw parameters mirroring the PyTorch module's init."""
    half = in_channels // 2
    k_perm, k1, k2, k3 = jax.random.split(key, 4)

    # InvertibleLinear: QR init of a (C, C) Gaussian, bias=False.
    pw = jnp.linalg.qr(jax.random.normal(
        k_perm, (in_channels, in_channels), dtype=jnp.float32))[0]

    def xavier(k, fan_in, fan_out):
        std = np.sqrt(2.0 / (fan_in + fan_out))
        return jax.random.normal(k, (fan_in, fan_out), dtype=jnp.float32) * std

    # MLP [half, interm, interm, interm, C]; weights (in, out), biases (1, out);
    # zero_output=True -> last layer weight & bias are zero.
    w1 = xavier(k1, half, interm_channels)
    b1 = jnp.zeros((1, interm_channels), jnp.float32)
    w2 = xavier(k2, interm_channels, interm_channels)
    b2 = jnp.zeros((1, interm_channels), jnp.float32)
    w3 = xavier(k3, interm_channels, interm_channels)
    b3 = jnp.zeros((1, interm_channels), jnp.float32)
    w4 = jnp.zeros((interm_channels, in_channels), jnp.float32)
    b4 = jnp.zeros((1, in_channels), jnp.float32)

    return (pw, w1, b1, w2, b2, w3, b3, w4, b4)


def prepare_params(params, mlp_dtype=jnp.bfloat16):
    """One-time preprocessing: split coupling heads, cast MLP weights, slogdet.

    mlp_dtype=jnp.bfloat16 targets the bf16-native MXU on v6e/v7x (and halves
    the resident weight VMEM); pass jnp.float32 to keep full precision.
    """
    pw, w1, b1, w2, b2, w3, b3, w4, b4 = params
    C = pw.shape[0]
    half = C // 2
    # TODO(synk): slogdet has no Pallas equivalent; parameter-only scalar,
    # computed once here (not per forward) and added in the wrapper.
    perm_logdet = jnp.linalg.slogdet(pw)[1]
    return dict(
        pw=pw.astype(jnp.float32),
        perm_logdet=perm_logdet,
        w1=w1.astype(mlp_dtype), b1=b1.astype(jnp.float32),
        w2=w2.astype(mlp_dtype), b2=b2.astype(jnp.float32),
        w3=w3.astype(mlp_dtype), b3=b3.astype(jnp.float32),
        w4m=w4[:, :half].astype(mlp_dtype), b4m=b4[:, :half].astype(jnp.float32),
        w4s=w4[:, half:].astype(mlp_dtype), b4s=b4[:, half:].astype(jnp.float32),
    )


def glow_revnet1d_forward(x, prepared, *, tile_b=128):
    """Forward of GlowRevNet1d.  tile_b: batch rows per grid step (>=128
    recommended for MXU utilization on real batch sizes)."""
    B, C = x.shape
    assert C % 2 == 0
    half = C // 2

    pw = prepared["pw"]
    w1, b1 = prepared["w1"], prepared["b1"]
    w2, b2 = prepared["w2"], prepared["b2"]
    w3, b3 = prepared["w3"], prepared["b3"]
    w4m, b4m = prepared["w4m"], prepared["b4m"]
    w4s, b4s = prepared["w4s"], prepared["b4s"]
    perm_logdet = prepared["perm_logdet"]
    interm = w1.shape[1]

    x = x.astype(jnp.float32)

    # --- ActNorm1d statistics (hoisted: the axis=0 reduction couples the
    # whole batch, so it must not live inside the batch-tiled kernel).
    # This matches the PyTorch data-dependent init followed by the apply.
    mean = jnp.mean(x, axis=0)
    var = jnp.mean((x - mean[None, :]) ** 2, axis=0)
    inv_std = jax.lax.rsqrt(var + 1e-5)                  # == exp(log_scale)
    an_logdet = -0.5 * jnp.sum(jnp.log(var + 1e-5))      # sum(log_scale)
    shift = -mean * inv_std

    # --- Fold ActNorm's diagonal affine into the permutation matmul and
    # pre-split column-wise so z1/z2 are lane-dense in the kernel.
    pw_eff = inv_std[:, None] * pw                        # (C, C)
    pbias = shift[None, :] @ pw                           # (1, C)
    pw1, pw2 = pw_eff[:, :half], pw_eff[:, half:]
    pb1, pb2 = pbias[:, :half], pbias[:, half:]

    # --- Batch tiling.
    if B <= tile_b:
        tile_b = B
        b_pad = B
    else:
        assert tile_b % 8 == 0, "tile_b must be a multiple of 8"
        b_pad = ((B + tile_b - 1) // tile_b) * tile_b
    if b_pad != B:
        x = jnp.pad(x, ((0, b_pad - B), (0, 0)))
    grid = (b_pad // tile_b,)

    def batch_spec(last):
        return pl.BlockSpec((tile_b, last), lambda i: (i, 0))

    def resident(arr):  # weights: same block every step -> stay in VMEM
        return pl.BlockSpec(arr.shape, lambda i: (0, 0))

    weights = (pw1, pb1, pw2, pb2, w1, b1, w2, b2, w3, b3, w4m, b4m, w4s, b4s)
    w_bytes = sum(int(a.size) * a.dtype.itemsize for a in weights)
    io_bytes = int(x.size * 4 + b_pad * (2 * half + 1) * 4 + w_bytes)
    flops = 2 * b_pad * (C * C + half * interm + 2 * interm * interm + interm * C)
    # VMEM budget: double-buffered batch tiles + resident weights + live acts,
    # with headroom; clamp to <= 64 MiB so it is valid on v7x as well.
    act_bytes = 4 * tile_b * (2 * C + 4 * half + 2 + 4 * interm)
    vmem_limit = int(min(max(2 * (w_bytes + act_bytes), 32 * 1024 * 1024),
                         64 * 1024 * 1024))

    y1, y2, logdet = pl.pallas_call(
        glow_revnet1d_kernel,
        out_shape=(
            jax.ShapeDtypeStruct((b_pad, half), jnp.float32),
            jax.ShapeDtypeStruct((b_pad, half), jnp.float32),
            jax.ShapeDtypeStruct((b_pad, 1), jnp.float32),
        ),
        grid_spec=pltpu.PrefetchScalarGridSpec(
            num_scalar_prefetch=0,
            grid=grid,
            in_specs=[batch_spec(C)] + [resident(a) for a in weights],
            out_specs=(batch_spec(half), batch_spec(half), batch_spec(1)),
        ),
        compiler_params=pltpu.CompilerParams(
            dimension_semantics=("parallel",),
            vmem_limit_bytes=vmem_limit,
        ),
        cost_estimate=pl.CostEstimate(
            flops=int(flops),
            transcendentals=int(2 * b_pad * half),
            bytes_accessed=io_bytes,
        ),
    )(x, *weights)

    y = jnp.concatenate([y1[:B], y2[:B]], axis=-1)
    logdet_out = logdet[:B, 0] + an_logdet + perm_logdet
    return y, logdet_out


def reference_forward(x, params):
    """Pure-JAX reference mirroring the PyTorch module semantics."""
    pw, w1, b1, w2, b2, w3, b3, w4, b4 = params
    B, C = x.shape
    half = C // 2
    mean = jnp.mean(x, axis=0, keepdims=True)
    var = jnp.mean((x - mean) ** 2, axis=0, keepdims=True)
    std = jnp.sqrt(var + 1e-5)
    log_scale = jnp.log(1.0 / std)
    shift = -mean * jnp.exp(log_scale)
    an_logdet = jnp.sum(log_scale)
    x = x * jnp.exp(log_scale) + shift
    x = x @ pw
    z1, z2 = x[:, :half], x[:, half:]
    h = jnp.maximum(z1 @ w1 + b1, 0.0)
    h = jnp.maximum(h @ w2 + b2, 0.0)
    h = jnp.maximum(h @ w3 + b3, 0.0)
    h = h @ w4 + b4
    mean_c = h[:, :half]
    scale = jax.nn.sigmoid(h[:, half:] + 4.0) + 1e-10
    z2 = (z2 + mean_c) * scale
    y = jnp.concatenate([z1, z2], axis=-1)
    logdet = (jnp.sum(jnp.log(scale), axis=-1) + an_logdet
              + jnp.linalg.slogdet(pw)[1])
    return y, logdet


if __name__ == "__main__":
    B = 40                      # padded to 48 internally (tile_b=16, grid=(3,))
    in_channels = 8
    interm_channels = in_channels * 16  # 128

    key = jax.random.PRNGKey(0)
    k_x, k_p, k_w4 = jax.random.split(key, 3)
    x = jax.random.normal(k_x, (B, in_channels), dtype=jnp.float32)
    params = make_params(k_p, in_channels, interm_channels)

    # --- Test 1: module-faithful init (zero last layer), bf16 MLP operands.
    prepared = prepare_params(params, mlp_dtype=jnp.bfloat16)
    y, logdet = glow_revnet1d_forward(x, prepared, tile_b=16)
    jax.block_until_ready((y, logdet))
    y_ref, logdet_ref = reference_forward(x, params)
    assert np.allclose(np.asarray(y), np.asarray(y_ref), rtol=2e-3, atol=2e-3)
    assert np.allclose(np.asarray(logdet), np.asarray(logdet_ref),
                       rtol=2e-3, atol=2e-3)

    # --- Test 2: random last layer (exercises mean/scale coupling heads),
    # f32 MLP operands for a tight numerical check of the full path.
    w4 = 0.05 * jax.random.normal(k_w4, (interm_channels, in_channels),
                                  dtype=jnp.float32)
    b4 = 0.05 * jax.random.normal(jax.random.fold_in(k_w4, 1),
                                  (1, in_channels), dtype=jnp.float32)
    params2 = params[:7] + (w4, b4)
    prepared2 = prepare_params(params2, mlp_dtype=jnp.float32)
    y2, logdet2 = glow_revnet1d_forward(x, prepared2, tile_b=16)
    jax.block_until_ready((y2, logdet2))
    y2_ref, logdet2_ref = reference_forward(x, params2)
    assert np.allclose(np.asarray(y2), np.asarray(y2_ref), rtol=2e-3, atol=2e-3)
    assert np.allclose(np.asarray(logdet2), np.asarray(logdet2_ref),
                       rtol=2e-3, atol=2e-3)

    print("KERNEL_OK")
</pallas_src>

<mosaic_0001>
module attributes {stable_mosaic.version = 11 : i64} {
  func.func @glow_revnet1d_kernel(%arg0: i32, %arg1: memref<16x8xf32, #tpu.memory_space<vmem>>, %arg2: memref<8x4xf32, #tpu.memory_space<vmem>>, %arg3: memref<1x4xf32, #tpu.memory_space<vmem>>, %arg4: memref<8x4xf32, #tpu.memory_space<vmem>>, %arg5: memref<1x4xf32, #tpu.memory_space<vmem>>, %arg6: memref<4x128xbf16, #tpu.memory_space<vmem>>, %arg7: memref<1x128xf32, #tpu.memory_space<vmem>>, %arg8: memref<128x128xbf16, #tpu.memory_space<vmem>>, %arg9: memref<1x128xf32, #tpu.memory_space<vmem>>, %arg10: memref<128x128xbf16, #tpu.memory_space<vmem>>, %arg11: memref<1x128xf32, #tpu.memory_space<vmem>>, %arg12: memref<128x4xbf16, #tpu.memory_space<vmem>>, %arg13: memref<1x4xf32, #tpu.memory_space<vmem>>, %arg14: memref<128x4xbf16, #tpu.memory_space<vmem>>, %arg15: memref<1x4xf32, #tpu.memory_space<vmem>>, %arg16: memref<16x4xf32, #tpu.memory_space<vmem>>, %arg17: memref<16x4xf32, #tpu.memory_space<vmem>>, %arg18: memref<16x1xf32, #tpu.memory_space<vmem>>) attributes {dimension_semantics = [#tpu.dimension_semantics<parallel>], iteration_bounds = array<i64: 3>, scalar_prefetch = 0 : i64, scratch_operands = 0 : i64, tpu.core_type = #tpu.core_type<tc>, window_params = [{transform_indices = @transform_0, window_bounds = array<i64: 16, 8>}, {pipeline_mode = #tpu.pipeline_mode<synchronous>, transform_indices = @transform_1, window_bounds = array<i64: 8, 4>}, {pipeline_mode = #tpu.pipeline_mode<synchronous>, transform_indices = @transform_2, window_bounds = array<i64: 1, 4>}, {pipeline_mode = #tpu.pipeline_mode<synchronous>, transform_indices = @transform_3, window_bounds = array<i64: 8, 4>}, {pipeline_mode = #tpu.pipeline_mode<synchronous>, transform_indices = @transform_4, window_bounds = array<i64: 1, 4>}, {pipeline_mode = #tpu.pipeline_mode<synchronous>, transform_indices = @transform_5, window_bounds = array<i64: 4, 128>}, {pipeline_mode = #tpu.pipeline_mode<synchronous>, transform_indices = @transform_6, window_bounds = array<i64: 1, 128>}, {pipeline_mode = #tpu.pipeline_mode<synchronous>, transform_indices = @transform_7, window_bounds = array<i64: 128, 128>}, {pipeline_mode = #tpu.pipeline_mode<synchronous>, transform_indices = @transform_8, window_bounds = array<i64: 1, 128>}, {pipeline_mode = #tpu.pipeline_mode<synchronous>, transform_indices = @transform_9, window_bounds = array<i64: 128, 128>}, {pipeline_mode = #tpu.pipeline_mode<synchronous>, transform_indices = @transform_10, window_bounds = array<i64: 1, 128>}, {pipeline_mode = #tpu.pipeline_mode<synchronous>, transform_indices = @transform_11, window_bounds = array<i64: 128, 4>}, {pipeline_mode = #tpu.pipeline_mode<synchronous>, transform_indices = @transform_12, window_bounds = array<i64: 1, 4>}, {pipeline_mode = #tpu.pipeline_mode<synchronous>, transform_indices = @transform_13, window_bounds = array<i64: 128, 4>}, {pipeline_mode = #tpu.pipeline_mode<synchronous>, transform_indices = @transform_14, window_bounds = array<i64: 1, 4>}, {transform_indices = @transform_15, window_bounds = array<i64: 16, 4>}, {transform_indices = @transform_16, window_bounds = array<i64: 16, 4>}, {transform_indices = @transform_17, window_bounds = array<i64: 16, 1>}]} {
    %c0 = arith.constant 0 : index
    %c0_0 = arith.constant 0 : index
    %0 = vector.load %arg1[%c0, %c0_0] : memref<16x8xf32, #tpu.memory_space<vmem>>, vector<16x8xf32>
    %c0_1 = arith.constant 0 : index
    %c0_2 = arith.constant 0 : index
    %1 = vector.load %arg2[%c0_1, %c0_2] : memref<8x4xf32, #tpu.memory_space<vmem>>, vector<8x4xf32>
    %cst = arith.constant dense<0.000000e+00> : vector<16x4xf32>
    %2 = tpu.matmul %0, %1, %cst {dimension_numbers = #tpu.dot_dimension_numbers<[1], [0], [0], [1], [0, 0, 1, 1], [], []>} : vector<16x8xf32>, vector<8x4xf32>, vector<16x4xf32> -> vector<16x4xf32>
    %c0_3 = arith.constant 0 : index
    %c0_4 = arith.constant 0 : index
    %3 = vector.load %arg3[%c0_3, %c0_4] : memref<1x4xf32, #tpu.memory_space<vmem>>, vector<1x4xf32>
    %4 = vector.broadcast %3 : vector<1x4xf32> to vector<16x4xf32>
    %5 = arith.addf %2, %4 : vector<16x4xf32>
    %c0_5 = arith.constant 0 : index
    %c0_6 = arith.constant 0 : index
    %6 = vector.load %arg4[%c0_5, %c0_6] : memref<8x4xf32, #tpu.memory_space<vmem>>, vector<8x4xf32>
    %cst_7 = arith.constant dense<0.000000e+00> : vector<16x4xf32>
    %7 = tpu.matmul %0, %6, %cst_7 {dimension_numbers = #tpu.dot_dimension_numbers<[1], [0], [0], [1], [0, 0, 1, 1], [], []>} : vector<16x8xf32>, vector<8x4xf32>, vector<16x4xf32> -> vector<16x4xf32>
    %c0_8 = arith.constant 0 : index
    %c0_9 = arith.constant 0 : index
    %8 = vector.load %arg5[%c0_8, %c0_9] : memref<1x4xf32, #tpu.memory_space<vmem>>, vector<1x4xf32>
    %9 = vector.broadcast %8 : vector<1x4xf32> to vector<16x4xf32>
    %10 = arith.addf %7, %9 : vector<16x4xf32>
    %11 = arith.truncf %5 : vector<16x4xf32> to vector<16x4xbf16>
    %c0_10 = arith.constant 0 : index
    %c0_11 = arith.constant 0 : index
    %12 = vector.load %arg6[%c0_10, %c0_11] : memref<4x128xbf16, #tpu.memory_space<vmem>>, vector<4x128xbf16>
    %cst_12 = arith.constant dense<0.000000e+00> : vector<16x128xf32>
    %13 = tpu.matmul %11, %12, %cst_12 {dimension_numbers = #tpu.dot_dimension_numbers<[1], [0], [0], [1], [0, 0, 1, 1], [], []>} : vector<16x4xbf16>, vector<4x128xbf16>, vector<16x128xf32> -> vector<16x128xf32>
    %c0_13 = arith.constant 0 : index
    %c0_14 = arith.constant 0 : index
    %14 = vector.load %arg7[%c0_13, %c0_14] : memref<1x128xf32, #tpu.memory_space<vmem>>, vector<1x128xf32>
    %15 = vector.broadcast %14 : vector<1x128xf32> to vector<16x128xf32>
    %16 = arith.addf %13, %15 : vector<16x128xf32>
    %cst_15 = arith.constant 0.000000e+00 : f32
    %17 = vector.broadcast %cst_15 : f32 to vector<16x128xf32>
    %18 = arith.maximumf %16, %17 : vector<16x128xf32>
    %19 = arith.truncf %18 : vector<16x128xf32> to vector<16x128xbf16>
    %c0_16 = arith.constant 0 : index
    %c0_17 = arith.constant 0 : index
    %20 = vector.load %arg8[%c0_16, %c0_17] : memref<128x128xbf16, #tpu.memory_space<vmem>>, vector<128x128xbf16>
    %cst_18 = arith.constant dense<0.000000e+00> : vector<16x128xf32>
    %21 = tpu.matmul %19, %20, %cst_18 {dimension_numbers = #tpu.dot_dimension_numbers<[1], [0], [0], [1], [0, 0, 1, 1], [], []>} : vector<16x128xbf16>, vector<128x128xbf16>, vector<16x128xf32> -> vector<16x128xf32>
    %c0_19 = arith.constant 0 : index
    %c0_20 = arith.constant 0 : index
    %22 = vector.load %arg9[%c0_19, %c0_20] : memref<1x128xf32, #tpu.memory_space<vmem>>, vector<1x128xf32>
    %23 = vector.broadcast %22 : vector<1x128xf32> to vector<16x128xf32>
    %24 = arith.addf %21, %23 : vector<16x128xf32>
    %cst_21 = arith.constant 0.000000e+00 : f32
    %25 = vector.broadcast %cst_21 : f32 to vector<16x128xf32>
    %26 = arith.maximumf %24, %25 : vector<16x128xf32>
    %27 = arith.truncf %26 : vector<16x128xf32> to vector<16x128xbf16>
    %c0_22 = arith.constant 0 : index
    %c0_23 = arith.constant 0 : index
    %28 = vector.load %arg10[%c0_22, %c0_23] : memref<128x128xbf16, #tpu.memory_space<vmem>>, vector<128x128xbf16>
    %cst_24 = arith.constant dense<0.000000e+00> : vector<16x128xf32>
    %29 = tpu.matmul %27, %28, %cst_24 {dimension_numbers = #tpu.dot_dimension_numbers<[1], [0], [0], [1], [0, 0, 1, 1], [], []>} : vector<16x128xbf16>, vector<128x128xbf16>, vector<16x128xf32> -> vector<16x128xf32>
    %c0_25 = arith.constant 0 : index
    %c0_26 = arith.constant 0 : index
    %30 = vector.load %arg11[%c0_25, %c0_26] : memref<1x128xf32, #tpu.memory_space<vmem>>, vector<1x128xf32>
    %31 = vector.broadcast %30 : vector<1x128xf32> to vector<16x128xf32>
    %32 = arith.addf %29, %31 : vector<16x128xf32>
    %cst_27 = arith.constant 0.000000e+00 : f32
    %33 = vector.broadcast %cst_27 : f32 to vector<16x128xf32>
    %34 = arith.maximumf %32, %33 : vector<16x128xf32>
    %35 = arith.truncf %34 : vector<16x128xf32> to vector<16x128xbf16>
    %c0_28 = arith.constant 0 : index
    %c0_29 = arith.constant 0 : index
    %36 = vector.load %arg12[%c0_28, %c0_29] : memref<128x4xbf16, #tpu.memory_space<vmem>>, vector<128x4xbf16>
    %cst_30 = arith.constant dense<0.000000e+00> : vector<16x4xf32>
    %37 = tpu.matmul %35, %36, %cst_30 {dimension_numbers = #tpu.dot_dimension_numbers<[1], [0], [0], [1], [0, 0, 1, 1], [], []>} : vector<16x128xbf16>, vector<128x4xbf16>, vector<16x4xf32> -> vector<16x4xf32>
    %c0_31 = arith.constant 0 : index
    %c0_32 = arith.constant 0 : index
    %38 = vector.load %arg13[%c0_31, %c0_32] : memref<1x4xf32, #tpu.memory_space<vmem>>, vector<1x4xf32>
    %39 = vector.broadcast %38 : vector<1x4xf32> to vector<16x4xf32>
    %40 = arith.addf %37, %39 : vector<16x4xf32>
    %c0_33 = arith.constant 0 : index
    %c0_34 = arith.constant 0 : index
    %41 = vector.load %arg14[%c0_33, %c0_34] : memref<128x4xbf16, #tpu.memory_space<vmem>>, vector<128x4xbf16>
    %cst_35 = arith.constant dense<0.000000e+00> : vector<16x4xf32>
    %42 = tpu.matmul %35, %41, %cst_35 {dimension_numbers = #tpu.dot_dimension_numbers<[1], [0], [0], [1], [0, 0, 1, 1], [], []>} : vector<16x128xbf16>, vector<128x4xbf16>, vector<16x4xf32> -> vector<16x4xf32>
    %c0_36 = arith.constant 0 : index
    %c0_37 = arith.constant 0 : index
    %43 = vector.load %arg15[%c0_36, %c0_37] : memref<1x4xf32, #tpu.memory_space<vmem>>, vector<1x4xf32>
    %44 = vector.broadcast %43 : vector<1x4xf32> to vector<16x4xf32>
    %45 = arith.addf %42, %44 : vector<16x4xf32>
    %cst_38 = arith.constant 4.000000e+00 : f32
    %46 = vector.broadcast %cst_38 : f32 to vector<16x4xf32>
    %47 = arith.addf %45, %46 : vector<16x4xf32>
    %48 = arith.negf %47 : vector<16x4xf32>
    %49 = math.exp %48 : vector<16x4xf32>
    %cst_39 = arith.constant 1.000000e+00 : f32
    %50 = vector.broadcast %cst_39 : f32 to vector<16x4xf32>
    %51 = arith.addf %50, %49 : vector<16x4xf32>
    %52 = arith.divf %50, %51 : vector<16x4xf32>
    %cst_40 = arith.constant 1.000000e-10 : f32
    %53 = vector.broadcast %cst_40 : f32 to vector<16x4xf32>
    %54 = arith.addf %52, %53 : vector<16x4xf32>
    %c0_41 = arith.constant 0 : index
    %c0_42 = arith.constant 0 : index
    %55 = vector.load %arg16[%c0_41, %c0_42] : memref<16x4xf32, #tpu.memory_space<vmem>>, vector<16x4xf32>
    tpu.vector_store %arg16[%c0_41, %c0_42], %5 {strides = array<i32>} : memref<16x4xf32, #tpu.memory_space<vmem>>, vector<16x4xf32>,
    %56 = arith.addf %10, %40 : vector<16x4xf32>
    %57 = arith.mulf %56, %54 : vector<16x4xf32>
    %c0_43 = arith.constant 0 : index
    %c0_44 = arith.constant 0 : index
    %58 = vector.load %arg17[%c0_43, %c0_44] : memref<16x4xf32, #tpu.memory_space<vmem>>, vector<16x4xf32>
    tpu.vector_store %arg17[%c0_43, %c0_44], %57 {strides = array<i32>} : memref<16x4xf32, #tpu.memory_space<vmem>>, vector<16x4xf32>,
    %59 = math.log %54 : vector<16x4xf32>
    %cst_45 = arith.constant dense<0.000000e+00> : vector<16xf32>
    %60 = vector.multi_reduction <add>, %59, %cst_45 [1] : vector<16x4xf32> to vector<16xf32>
    %61 = vector.shape_cast %60 : vector<16xf32> to vector<16x1xf32>
    %c0_46 = arith.constant 0 : index
    %c0_47 = arith.constant 0 : index
    %62 = vector.load %arg18[%c0_46, %c0_47] : memref<16x1xf32, #tpu.memory_space<vmem>>, vector<16x1xf32>
    tpu.vector_store %arg18[%c0_46, %c0_47], %61 {strides = array<i32>} : memref<16x1xf32, #tpu.memory_space<vmem>>, vector<16x1xf32>,
    return
  }
  func.func @transform_0(%arg0: i32) -> (i32, i32) {
    %c0_i32 = arith.constant 0 : i32
    %c0_i32_0 = arith.constant 0 : i32
    return %arg0, %c0_i32 : i32, i32
  }
  func.func @transform_1(%arg0: i32) -> (i32, i32) {
    %c0_i32 = arith.constant 0 : i32
    %c0_i32_0 = arith.constant 0 : i32
    %c0_i32_1 = arith.constant 0 : i32
    return %c0_i32, %c0_i32_0 : i32, i32
  }
  func.func @transform_2(%arg0: i32) -> (i32, i32) {
    %c0_i32 = arith.constant 0 : i32
    %c0_i32_0 = arith.constant 0 : i32
    %c0_i32_1 = arith.constant 0 : i32
    return %c0_i32, %c0_i32_0 : i32, i32
  }
  func.func @transform_3(%arg0: i32) -> (i32, i32) {
    %c0_i32 = arith.constant 0 : i32
    %c0_i32_0 = arith.constant 0 : i32
    %c0_i32_1 = arith.constant 0 : i32
    return %c0_i32, %c0_i32_0 : i32, i32
  }
  func.func @transform_4(%arg0: i32) -> (i32, i32) {
    %c0_i32 = arith.constant 0 : i32
    %c0_i32_0 = arith.constant 0 : i32
    %c0_i32_1 = arith.constant 0 : i32
    return %c0_i32, %c0_i32_0 : i32, i32
  }
  func.func @transform_5(%arg0: i32) -> (i32, i32) {
    %c0_i32 = arith.constant 0 : i32
    %c0_i32_0 = arith.constant 0 : i32
    %c0_i32_1 = arith.constant 0 : i32
    return %c0_i32, %c0_i32_0 : i32, i32
  }
  func.func @transform_6(%arg0: i32) -> (i32, i32) {
    %c0_i32 = arith.constant 0 : i32
    %c0_i32_0 = arith.constant 0 : i32
    %c0_i32_1 = arith.constant 0 : i32
    return %c0_i32, %c0_i32_0 : i32, i32
  }
  func.func @transform_7(%arg0: i32) -> (i32, i32) {
    %c0_i32 = arith.constant 0 : i32
    %c0_i32_0 = arith.constant 0 : i32
    %c0_i32_1 = arith.constant 0 : i32
    return %c0_i32, %c0_i32_0 : i32, i32
  }
  func.func @transform_8(%arg0: i32) -> (i32, i32) {
    %c0_i32 = arith.constant 0 : i32
    %c0_i32_0 = arith.constant 0 : i32
    %c0_i32_1 = arith.constant 0 : i32
    return %c0_i32, %c0_i32_0 : i32, i32
  }
  func.func @transform_9(%arg0: i32) -> (i32, i32) {
    %c0_i32 = arith.constant 0 : i32
    %c0_i32_0 = arith.constant 0 : i32
    %c0_i32_1 = arith.constant 0 : i32
    return %c0_i32, %c0_i32_0 : i32, i32
  }
  func.func @transform_10(%arg0: i32) -> (i32, i32) {
    %c0_i32 = arith.constant 0 : i32
    %c0_i32_0 = arith.constant 0 : i32
    %c0_i32_1 = arith.constant 0 : i32
    return %c0_i32, %c0_i32_0 : i32, i32
  }
  func.func @transform_11(%arg0: i32) -> (i32, i32) {
    %c0_i32 = arith.constant 0 : i32
    %c0_i32_0 = arith.constant 0 : i32
    %c0_i32_1 = arith.constant 0 : i32
    return %c0_i32, %c0_i32_0 : i32, i32
  }
  func.func @transform_12(%arg0: i32) -> (i32, i32) {
    %c0_i32 = arith.constant 0 : i32
    %c0_i32_0 = arith.constant 0 : i32
    %c0_i32_1 = arith.constant 0 : i32
    return %c0_i32, %c0_i32_0 : i32, i32
  }
  func.func @transform_13(%arg0: i32) -> (i32, i32) {
    %c0_i32 = arith.constant 0 : i32
    %c0_i32_0 = arith.constant 0 : i32
    %c0_i32_1 = arith.constant 0 : i32
    return %c0_i32, %c0_i32_0 : i32, i32
  }
  func.func @transform_14(%arg0: i32) -> (i32, i32) {
    %c0_i32 = arith.constant 0 : i32
    %c0_i32_0 = arith.constant 0 : i32
    %c0_i32_1 = arith.constant 0 : i32
    return %c0_i32, %c0_i32_0 : i32, i32
  }
  func.func @transform_15(%arg0: i32) -> (i32, i32) {
    %c0_i32 = arith.constant 0 : i32
    %c0_i32_0 = arith.constant 0 : i32
    return %arg0, %c0_i32 : i32, i32
  }
  func.func @transform_16(%arg0: i32) -> (i32, i32) {
    %c0_i32 = arith.constant 0 : i32
    %c0_i32_0 = arith.constant 0 : i32
    return %arg0, %c0_i32 : i32, i32
  }
  func.func @transform_17(%arg0: i32) -> (i32, i32) {
    %c0_i32 = arith.constant 0 : i32
    %c0_i32_0 = arith.constant 0 : i32
    return %arg0, %c0_i32 : i32, i32
  }
}

</mosaic_0001>

<bundles_post_ra>
// kernel: tpu_custom_call.1
= control target key start
LH: loop header
LB: loop body
LE: loop exit
PB: predicated region body
PF: predicated region fallthrough
CT: control target
= control target key end

     0   :  { %s1786_s24 = smov 0   ;;  %s2001_s0 = inlined_call_operand.vmem [shape: f32[48,8], index: 0, kind: input, shape index: {}]   ;;  %s2002_s1 = inlined_call_operand.vmem [shape: f32[8,4], index: 1, kind: input, shape index: {}]   ;;  %s2003_s2 = inlined_call_operand.vmem [shape: f32[1,4], index: 2, kind: input, shape index: {}]   ;;  %s2004_s3 = inlined_call_operand.vmem [shape: f32[8,4], index: 3, kind: input, shape index: {}]   ;;  %s2005_s4 = inlined_call_operand.vmem [shape: f32[1,4], index: 4, kind: input, shape index: {}]   ;;  %s2006_s5 = inlined_call_operand.vmem [shape: bf16[4,128], index: 5, kind: input, shape index: {}]   ;;  %s2007_s6 = inlined_call_operand.vmem [shape: f32[1,128], index: 6, kind: input, shape index: {}]   ;;  %s2008_s7 = inlined_call_operand.vmem [shape: bf16[128,128], index: 7, kind: input, shape index: {}]   ;;  %s2009_s8 = inlined_call_operand.vmem [shape: f32[1,128], index: 8, kind: input, shape index: {}]   ;;  %s2010_s9 = inlined_call_operand.vmem [shape: bf16[128,128], index: 9, kind: input, shape index: {}]   ;;  %s2011_s10 = inlined_call_operand.vmem [shape: f32[1,128], index: 10, kind: input, shape index: {}]   ;;  %s2012_s11 = inlined_call_operand.vmem [shape: bf16[128,4], index: 11, kind: input, shape index: {}]   ;;  %s2013_s12 = inlined_call_operand.vmem [shape: f32[1,4], index: 12, kind: input, shape index: {}]   ;;  %s2014_s13 = inlined_call_operand.vmem [shape: bf16[128,4], index: 13, kind: input, shape index: {}]   ;;  %s2015_s14 = inlined_call_operand.vmem [shape: f32[1,4], index: 14, kind: input, shape index: {}]   ;;  %s2016_s15 = inlined_call_operand.vmem [shape: f32[48,4], index: 15, kind: output, shape index: {0}]   ;;  %s2017_s16 = inlined_call_operand.vmem [shape: f32[48,4], index: 16, kind: output, shape index: {1}]   ;;  %s2018_s17 = inlined_call_operand.vmem [shape: f32[48,1], index: 17, kind: output, shape index: {2}]  }
   0x1   :  { %2019 = sst [smem:[#allocation2_spill]] %s2001_s0 }
   0x2   :  { %2020 = sst [smem:[#allocation3_spill]] %s2002_s1 }
   0x3 LB: > { %s1431_s25 = sadd.s32 4294967295, %s1692_s24   ;;  %p1435_p0 = scmp.ge.s32.totalorder %s1692_s24, 1  ;;  %s1692_s24 = sphi %s1786_s24, %s28_s24  }
   0x4   : > { %p493_p1 = scmp.lt.s32.totalorder %s1692_s24, 4 }
   0x6   : > { %p494_p2 = pnand %p1435_p0, %p493_p1 }
   0x7   : > { %s2021_s28 = sld [smem:[#allocation3_spill]] (!%p494_p2)  ;;  %s1436_s29 = sshll.u32 (!%p494_p2), %s1431_s25, 1  ;;  %vm590_vm0 = vcmask (!%p494_p2), 64512   ;;  %v756_v3 = vld [vmem:[%s2006_s5] sm:$0x3] (!%p494_p2)  ;;  %vm768_vm1 = vcmask (!%p494_p2), 1041408  }
   0x8   : > { %497 = sbr.rel (%p494_p2) target bundleno = 1302 (0x516), region = 80  ;;  %p556_p3 = scmp.lt.s32.totalorder (!%p494_p2), %s1436_s29, 5  ;;  %v1694_v4 = vmov (!%p494_p2), 0.0   ;;  %v770_v5 = vsel (!%p494_p2), %vm768_vm1, %v756_v3, 0  ;;  %vm1695_vm2 = vmmov (!%p494_p2), 0   ;;  %v672_v6 = vld [vmem:[%s2004_s3] sm:$0xff] (!%p494_p2) }
   0x9   : > { %s2022_s19 = sld [smem:[#allocation2_spill]] (!%p494_p2)  ;;  %v1642_v7 = vld [vmem:[%s2008_s7] sm:$0xff] (!%p494_p2)   ;;  %1541 = vmatprep.subr.mxu1 (!%p494_p2), %v672_v6  ;;  %v1643_v8 = vld [vmem:[%s2008_s7 + $0x8] sm:$0xff] (!%p494_p2)   ;;  %v1644_v9 = vld [vmem:[%s2008_s7 + $0x10] sm:$0xff] (!%p494_p2)   ;;  %vm764_vm3 = vcmask (!%p494_p2), 31744   ;;  %vm1304_vm4 = vcmask (!%p494_p2), 7168  }
   0xa   : > { %1542 = vmatpush3.msra.mxu1 (!%p494_p2), %v672_v6  ;;  %v1645_v10 = vld [vmem:[%s2008_s7 + $0x18] sm:$0xff] (!%p494_p2)   ;;  %v1646_v11 = vld [vmem:[%s2008_s7 + $0x20] sm:$0xff] (!%p494_p2)   ;;  %v1647_v12 = vld [vmem:[%s2008_s7 + $0x28] sm:$0xff] (!%p494_p2)  }
   0xb   : > { %1552 = vmatprep.subr.bf16.mxu1 (!%p494_p2), %v1694_v4  ;;  %v1444_v13 = vld [vmem:[%s2003_s2] ss:$0 sm:$0xff] (!%p494_p2)  ;;  %v1648_v19 = vld [vmem:[%s2008_s7 + $0x30] sm:$0xff] (!%p494_p2)   ;;  %v1649_v20 = vld [vmem:[%s2008_s7 + $0x38] sm:$0xff] (!%p494_p2)  }
   0xc   : > { %v1650_v22 = vld [vmem:[%s2010_s9] sm:$0xff] (!%p494_p2)   ;;  %v1651_v24 = vld [vmem:[%s2010_s9 + $0x8] sm:$0xff] (!%p494_p2)   ;;  %v1652_v25 = vld [vmem:[%s2010_s9 + $0x10] sm:$0xff] (!%p494_p2)  }
   0xd   : > { %v582_v0 = vld [vmem:[%s2021_s28] sm:$0xff] (!%p494_p2)  ;;  %v1653_v26 = vld [vmem:[%s2010_s9 + $0x18] sm:$0xff] (!%p494_p2)   ;;  %v1655_v28 = vld [vmem:[%s2010_s9 + $0x28] sm:$0xff] (!%p494_p2)  }
   0xe   : > { %1536 = vmatprep.subr.mxu0 (!%p494_p2), %v582_v0  ;;  %v1654_v27 = vld [vmem:[%s2010_s9 + $0x20] sm:$0xff] (!%p494_p2)   ;;  %v1656_v39 = vld [vmem:[%s2010_s9 + $0x30] sm:$0xff] (!%p494_p2)   ;;  %v1657_v40 = vld [vmem:[%s2010_s9 + $0x38] sm:$0xff] (!%p494_p2)  }
   0xf   : > { %1537 = vmatpush3.msra.mxu0 %v582_v0  ;;  %s2024_s29 = smov (!%p556_p3, %s1436_s29), 5  ;;  %v1450_v29 = vld [vmem:[%s2007_s6] ss:$0 sm:$0xff]  ;;  %v1660_v42 = vld [vmem:[%s2012_s11 + $0x8] sm:$0xff]   ;;  %v1662_v43 = vld [vmem:[%s2012_s11 + $0x10] sm:$0xff]  }
  0x10   : > { %s1797_s0 = sshll.u32 %s2024_s29, 3  ;;  %1546 = vmatprep.subr.bf16.mxu0 %v1694_v4  ;;  %v1658_v41 = vld [vmem:[%s2012_s11] sm:$0xff]   ;;  %v1664_v44 = vld [vmem:[%s2012_s11 + $0x18] sm:$0xff]   ;;  %v1668_v46 = vld [vmem:[%s2012_s11 + $0x28] sm:$0xff]  }
  0x11   : > { %s559_s1 = scalar_lea.vmem %s2022_s19, %s1797_s0  ;;  %s565_s28 = scalar_lea.vmem %s2016_s15, %s1797_s0  ;;  %v1666_v45 = vld [vmem:[%s2012_s11 + $0x20] sm:$0xff]   ;;  %v1661_v58 = vld [vmem:[%s2014_s13 + $0x8] sm:$0xff]   ;;  %v1663_v59 = vld [vmem:[%s2014_s13 + $0x10] sm:$0xff]  }
  0x12   : > { %v580_v1 = vld [vmem:[%s559_s1] sm:$0xff]  ;;  %v581_v2 = vld [vmem:[%s559_s1 + $0x8] sm:$0xff]  ;;  %v1665_v60 = vld [vmem:[%s2014_s13 + $0x18] sm:$0xff]   ;;  %s571_s30 = scalar_lea.vmem %s2017_s16, %s1797_s0  ;;  %s577_s1 = scalar_lea.vmem %s2018_s17, %s1797_s0 }
  0x13   : > { %1538 = vmatprep.mubr.msk.f32.mxu0 %vm590_vm0, %v580_v1  ;;  %1543 = vmatprep.mubr.msk.f32.mxu1 %vm590_vm0, %v580_v1  ;;  %v1452_v47 = vld [vmem:[%s2009_s8] ss:$0 sm:$0xff]  ;;  %v1669_v62 = vld [vmem:[%s2014_s13 + $0x28] sm:$0xff]   ;;  %v1670_v63 = vld [vmem:[%s2012_s11 + $0x30] sm:$0xff]  }
  0x14   : > { %1539 = vmatmul.mubr.msk.f32.vlgmr.msra.gmra.mrb[0].mxu0 %vm590_vm0, %v581_v2  ;;  %1544 = vmatmul.mubr.msk.f32.vlgmr.msra.gmra.mrb[0].mxu1 %vm590_vm0, %v581_v2  ;;  %v1659_v56 = vld [vmem:[%s2014_s13] sm:$0xff]   ;;  %v1671_v0 = vld [vmem:[%s2014_s13 + $0x30] sm:$0xff]   ;;  %v1672_v1 = vld [vmem:[%s2012_s11 + $0x38] sm:$0xff]  }
  0x15   : > { %1547 = vmatpush3.bf16.msra.mxu0 %v770_v5  ;;  %1548 = vmatprep.mubr.msk.bf16.mxu0 %vm1695_vm2, %v1694_v4  ;;  %v1667_v61 = vld [vmem:[%s2014_s13 + $0x20] sm:$0xff]   ;;  %v1673_v2 = vld [vmem:[%s2014_s13 + $0x38] sm:$0xff]  }
  0x16   : > { %1572 = vmatprep.subr.bf16.mxu0 %v1694_v4  ;;  %1553 = vmatpush3.bf16.msra.mxu1 %v1642_v7  ;;  %v1461_v3 = vld [vmem:[%s2011_s10] ss:$0 sm:$0xff] }
  0x17   : > { %1568 = vmatprep.mubr.msk.bf16.mxu1 %vm1695_vm2, %v1694_v4  ;;  %1554 = vmatprep.subr.bf16.mxu1 %v1694_v4 }
  0x1a   : > { %1555 = vmatpush3.bf16.msra.mxu1 %v1643_v8 }
  0x1b   : > { %1556 = vmatprep.subr.bf16.mxu1 %v1694_v4 }
  0x1e   : > { %1557 = vmatpush3.bf16.msra.mxu1 %v1644_v9 }
  0x1f   : > { %1558 = vmatprep.subr.bf16.mxu1 %v1694_v4 }
  0x22   : > { %1559 = vmatpush3.bf16.msra.mxu1 %v1645_v10 }
  0x23   : > { %1560 = vmatprep.subr.bf16.mxu1 %v1694_v4 }
  0x26   : > { %1561 = vmatpush3.bf16.msra.mxu1 %v1646_v11 }
  0x27   : > { %1562 = vmatprep.subr.bf16.mxu1 %v1694_v4 }
  0x2a   : > { %1563 = vmatpush3.bf16.msra.mxu1 %v1647_v12 }
  0x2b   : > { %1564 = vmatprep.subr.bf16.mxu1 %v1694_v4 }
  0x2e   : > { %1565 = vmatpush3.bf16.msra.mxu1 %v1648_v19 }
  0x2f   : > { %1566 = vmatprep.subr.bf16.mxu1 %v1694_v4 }
  0x32   : > { %1567 = vmatpush3.bf16.msra.mxu1 %v1649_v20 }
  0x33   : > { %1592 = vmatprep.subr.bf16.mxu1 %v1694_v4 }
  0xe7   : > { %v1540_v14 = vpop.f32.mrb[0].mxu0  ;;  %v1864_v21 = vpop.f32.mrb[0].mxu1 }
  0xe8   : > { %v669_v15 = vadd.f32 %v1540_v14, %v1444_v13  ;;  %v663_v16 = vpop.f32.mrb[1].mxu0  ;;  %v1869_v23 = vpop.f32.mrb[1].mxu1  ;;  %v1470_v14 = vld [vmem:[%s2013_s12] ss:$0 sm:$0xff] }
  0xe9   : > { %v664_v17 = vadd.f32 %v1444_v13, %v663_v16  ;;  %v1447_v13 = vld [vmem:[%s2005_s4] ss:$0 sm:$0xff] }
  0xea   : > { %1287 = vst.msk [vmem:[%s565_s28 + $0x8] sm:$0xff] %vm764_vm3, %v669_v15 }
  0xeb   : > { %v755_v18 = vpack.c.bf16 %v669_v15, %v664_v17  ;;  %1286 = vst.msk [vmem:[%s565_s28] sm:$0xff] %vm764_vm3, %v664_v17  ;;  %v1479_v15 = vld [vmem:[%s2015_s14] ss:$0 sm:$0xff] }
  0xed   : > { %1549 = vmatmul.mubr.msk.bf16.vlgmr.msra.gmra.mrb[4].mxu0 %vm764_vm3, %v755_v18  ;;  %v747_v18 = vadd.f32 %v1447_v13, %v1869_v23 }
  0xee   : > { %1588 = vmatprep.mubr.msk.bf16.mxu0 %vm1695_vm2, %v1694_v4  ;;  %1573 = vmatpush3.bf16.msra.mxu0 %v1650_v22 }
  0xef   : > { %1574 = vmatprep.subr.bf16.mxu0 %v1694_v4 }
  0xf2   : > { %1575 = vmatpush3.bf16.msra.mxu0 %v1651_v24 }
  0xf3   : > { %1576 = vmatprep.subr.bf16.mxu0 %v1694_v4 }
  0xf6   : > { %1577 = vmatpush3.bf16.msra.mxu0 %v1652_v25  ;;  %v752_v25 = vadd.f32 %v1864_v21, %v1447_v13 }
  0xf7   : > { %1578 = vmatprep.subr.bf16.mxu0 %v1694_v4 }
  0xfa   : > { %1579 = vmatpush3.bf16.msra.mxu0 %v1653_v26 }
  0xfb   : > { %1580 = vmatprep.subr.bf16.mxu0 %v1694_v4 }
  0xfe   : > { %1581 = vmatpush3.bf16.msra.mxu0 %v1654_v27 }
  0xff   : > { %1582 = vmatprep.subr.bf16.mxu0 %v1694_v4 }
 0x102   : > { %1583 = vmatpush3.bf16.msra.mxu0 %v1655_v28 }
 0x103   : > { %1584 = vmatprep.subr.bf16.mxu0 %v1694_v4 }
 0x106   : > { %1585 = vmatpush3.bf16.msra.mxu0 %v1656_v39 }
 0x107   : > { %1586 = vmatprep.subr.bf16.mxu0 %v1694_v4 }
 0x10a   : > { %1587 = vmatpush3.bf16.msra.mxu0 %v1657_v40 }
 0x10b   : > { %1612 = vmatprep.subr.bf16.mxu0 %v1694_v4 }
 0x1c0   : > { %v806_v30 = vpop.f32.mrb[4].mxu0 }
 0x1c1   : > { %v807_v31 = vadd.f32 %v1450_v29, %v806_v30  ;;  %v1550_v32 = vpop.f32.mrb[5].mxu0 }
 0x1c2   : > { %v809_v33 = vpop.f32.mrb[6].mxu0 }
 0x1c3   : > { %v810_v34 = vadd.f32 %v1450_v29, %v809_v33  ;;  %v1551_v35 = vpop.f32.mrb[7].mxu0  ;;  %v813_v36 = vmax.f32 %v807_v31, 0.0 }
 0x1c5   : > { %v814_v37 = vmax.f32 %v810_v34, 0.0 }
 0x1c7   : > { %v815_v38 = vpack.c.bf16 %v814_v37, %v813_v36 }
 0x1c9   : > { %1569 = vmatmul.mubr.bf16.vlgmr.msra.gmra.mrb[4].mxu1 %v815_v38 }
 0x1ca   : > { %1608 = vmatprep.mubr.msk.bf16.mxu1 %vm1695_vm2, %v1694_v4  ;;  %1593 = vmatpush3.bf16.msra.mxu1 %v1658_v41 }
 0x1cb   : > { %1594 = vmatprep.subr.bf16.mxu1 %v1694_v4 }
 0x1ce   : > { %1595 = vmatpush3.bf16.msra.mxu1 %v1660_v42 }
 0x1cf   : > { %1596 = vmatprep.subr.bf16.mxu1 %v1694_v4 }
 0x1d2   : > { %1597 = vmatpush3.bf16.msra.mxu1 %v1662_v43 }
 0x1d3   : > { %1598 = vmatprep.subr.bf16.mxu1 %v1694_v4 }
 0x1d6   : > { %1599 = vmatpush3.bf16.msra.mxu1 %v1664_v44 }
 0x1d7   : > { %1600 = vmatprep.subr.bf16.mxu1 %v1694_v4 }
 0x1da   : > { %1601 = vmatpush3.bf16.msra.mxu1 %v1666_v45 }
 0x1db   : > { %1602 = vmatprep.subr.bf16.mxu1 %v1694_v4 }
 0x1de   : > { %1603 = vmatpush3.bf16.msra.mxu1 %v1668_v46 }
 0x1df   : > { %1604 = vmatprep.subr.bf16.mxu1 %v1694_v4 }
 0x1e2   : > { %1605 = vmatpush3.bf16.msra.mxu1 %v1670_v63 }
 0x1e3   : > { %1606 = vmatprep.subr.bf16.mxu1 %v1694_v4 }
 0x1e6   : > { %1607 = vmatpush3.bf16.msra.mxu1 %v1672_v1 }
 0x29c   : > { %v921_v48 = vpop.f32.mrb[4].mxu1 }
 0x29d   : > { %v922_v49 = vadd.f32 %v1452_v47, %v921_v48  ;;  %v1570_v50 = vpop.f32.mrb[5].mxu1 }
 0x29e   : > { %v924_v51 = vpop.f32.mrb[6].mxu1 }
 0x29f   : > { %v925_v52 = vadd.f32 %v1452_v47, %v924_v51  ;;  %v1571_v53 = vpop.f32.mrb[7].mxu1  ;;  %v928_v54 = vmax.f32 %v922_v49, 0.0 }
 0x2a1   : > { %v929_v55 = vmax.f32 %v925_v52, 0.0 }
 0x2a3   : > { %v930_v57 = vpack.c.bf16 %v929_v55, %v928_v54 }
 0x2a5   : > { %1589 = vmatmul.mubr.bf16.vlgmr.msra.gmra.mrb[8].mxu0 %v930_v57 }
 0x2a6   : > { %1613 = vmatpush3.bf16.msra.mxu0 %v1659_v56  ;;  %1628 = vmatprep.mubr.msk.bf16.mxu0 %vm1695_vm2, %v1694_v4 }
 0x2a7   : > { %1614 = vmatprep.subr.bf16.mxu0 %v1694_v4 }
 0x2aa   : > { %1615 = vmatpush3.bf16.msra.mxu0 %v1661_v58 }
 0x2ab   : > { %1616 = vmatprep.subr.bf16.mxu0 %v1694_v4 }
 0x2ae   : > { %1617 = vmatpush3.bf16.msra.mxu0 %v1663_v59 }
 0x2af   : > { %1618 = vmatprep.subr.bf16.mxu0 %v1694_v4 }
 0x2b2   : > { %1619 = vmatpush3.bf16.msra.mxu0 %v1665_v60 }
 0x2b3   : > { %1620 = vmatprep.subr.bf16.mxu0 %v1694_v4 }
 0x2b6   : > { %1621 = vmatpush3.bf16.msra.mxu0 %v1667_v61 }
 0x2b7   : > { %1622 = vmatprep.subr.bf16.mxu0 %v1694_v4 }
 0x2ba   : > { %1623 = vmatpush3.bf16.msra.mxu0 %v1669_v62 }
 0x2bb   : > { %1624 = vmatprep.subr.bf16.mxu0 %v1694_v4 }
 0x2be   : > { %1625 = vmatpush3.bf16.msra.mxu0 %v1671_v0 }
 0x2bf   : > { %1626 = vmatprep.subr.bf16.mxu0 %v1694_v4 }
 0x2c2   : > { %1627 = vmatpush3.bf16.msra.mxu0 %v1673_v2 }
 0x378   : > { %v1036_v5 = vpop.f32.mrb[8].mxu0 }
 0x379   : > { %v1037_v6 = vadd.f32 %v1461_v3, %v1036_v5  ;;  %v1590_v7 = vpop.f32.mrb[9].mxu0 }
 0x37a   : > { %v1039_v8 = vpop.f32.mrb[10].mxu0 }
 0x37b   : > { %v1040_v9 = vadd.f32 %v1461_v3, %v1039_v8  ;;  %v1591_v4 = vpop.f32.mrb[11].mxu0  ;;  %v1043_v10 = vmax.f32 %v1037_v6, 0.0 }
 0x37d   : > { %v1044_v11 = vmax.f32 %v1040_v9, 0.0 }
 0x37f   : > { %v1045_v12 = vpack.c.bf16 %v1044_v11, %v1043_v10 }
 0x381   : > { %1609 = vmatmul.mubr.bf16.vlgmr.msra.gmra.mrb[8].mxu1 %v1045_v12  ;;  %1629 = vmatmul.mubr.bf16.vlgmr.msra.gmra.mrb[12].mxu0 %v1045_v12 }
 0x454   : > { %v1151_v16 = vpop.f32.mrb[8].mxu1  ;;  %v1263_v17 = vpop.f32.mrb[12].mxu0 }
 0x455   : > { %v1152_v19 = vadd.f32 %v1470_v14, %v1151_v16  ;;  %v1264_v20 = vadd.f32 %v1479_v15, %v1263_v17  ;;  %v1610_v22 = vpop.f32.mrb[9].mxu1  ;;  %v1630_v24 = vpop.f32.mrb[13].mxu0 }
 0x456   : > { %v1154_v26 = vpop.f32.mrb[10].mxu1  ;;  %v1266_v27 = vpop.f32.mrb[14].mxu0 }
 0x457   : > { %v1288_v28 = vadd.f32 %v1152_v19, %v747_v18  ;;  %v1270_v29 = vadd.f32 4.0, %v1264_v20  ;;  %v1155_v30 = vadd.f32 %v1470_v14, %v1154_v26  ;;  %v1267_v31 = vadd.f32 %v1479_v15, %v1266_v27  ;;  %v1611_v32 = vpop.f32.mrb[11].mxu1  ;;  %v1631_v33 = vpop.f32.mrb[15].mxu0 }
 0x459   : > { %v1488_v34 = vmul.f32 -1.442695, %v1270_v29  ;;  %v1289_v35 = vadd.f32 %v1155_v30, %v752_v25  ;;  %v1271_v36 = vadd.f32 4.0, %v1267_v31 }
 0x45b   : > { %1674 = vpow2.f32 %v1488_v34  ;;  %v1489_v23 = vmul.f32 -1.442695, %v1271_v36 }
 0x45d   : > { %1676 = vpow2.f32 %v1489_v23 }
 0x465   : > { %v1675_v37 = vpop.eup %1674 }
 0x466   : > { %v1278_v38 = vadd.f32 1.0, %v1675_v37 }
 0x467   : > { %v1677_v39 = vpop.eup %1676 }
 0x468   : > { %1678 = vrcp.f32 %v1278_v38  ;;  %v1279_v21 = vadd.f32 1.0, %v1677_v39 }
 0x46a   : > { %1680 = vrcp.f32 %v1279_v21 }
 0x472   : > { %v1679_v40 = vpop.eup %1678 }
 0x473   : > { %v1284_v41 = vadd.f32 1e-10, %v1679_v40 }
 0x474   : > { %v1681_v42 = vpop.eup %1680 }
 0x475   : > { %1682 = vlog2.f32 %v1284_v41  ;;  %v1290_v43 = vmul.f32 %v1288_v28, %v1284_v41  ;;  %v1285_v44 = vadd.f32 1e-10, %v1681_v42 }
 0x477   : > { %1292 = vst.msk [vmem:[%s571_s30] sm:$0xff] %vm764_vm3, %v1290_v43  ;;  %1684 = vlog2.f32 %v1285_v44  ;;  %v1291_v45 = vmul.f32 %v1289_v35, %v1285_v44 }
 0x479   : > { %1293 = vst.msk [vmem:[%s571_s30 + $0x8] sm:$0xff] %vm764_vm3, %v1291_v45 }
 0x47f   : > { %v1683_v46 = vpop.eup %1682 }
 0x480   : > { %v1295_v47 = vmul.f32 0.6931472, %v1683_v46 }
 0x481   : > { %v1685_v48 = vpop.eup %1684 }
 0x482   : > { %v1298_v49 = vsel %vm764_vm3, %v1295_v47, 0.0  ;;  %v1297_v50 = vmul.f32 0.6931472, %v1685_v48 }
 0x483   : > { %1299 = vadd.xlane.f32.xlu0 %v1298_v49 }
 0x484   : > { %v1301_v51 = vsel %vm764_vm3, %v1297_v50, 0.0 }
 0x487   : > { %1302 = vadd.xlane.f32.xlu0 %v1301_v51 }
 0x510   : > { %v1300_v52 = vpop.xlane.xlu0 %1299 }
 0x511   : > { %1305 = vst.msk [vmem:[%s577_s1] sm:$0xff] %vm1304_vm4, %v1300_v52 }
 0x514   : > { %v1303_v53 = vpop.xlane.xlu0 %1302 }
 0x515   : > { %1306 = vst.msk [vmem:[%s577_s1 + $0x8] sm:$0xff] %vm1304_vm4, %v1303_v53 }
 0x516 PF: > { %s28_s24 = sadd.s32 1, %s1692_s24  }
 0x517   : > { %p25_p4 = scmp.ge.s32.totalorder %s28_s24, 5  }
 0x519   :  { %27 = sbr.rel (!%p25_p4) target bundleno = 3 (0x3), region = 134 }

</bundles_post_ra>
